<compile_context>
chip_gen: v7x
topology: tpu7x:2x2x1
jax: 0.10.0
libtpu: 0.0.40
codegen_flags: <defaults>
</compile_context>

<pallas_src>
import jax
import jax.numpy as jnp
import numpy as np
from jax import lax
from jax.experimental import pallas as pl
from jax.experimental.pallas import tpu as pltpu

# ---- problem sizes (consistent with the module's config) ---------------------
B = 2    # batch
S = 4    # input_sequence_length  (conv channels)
E = 16   # embedding_dim          (spatial H = W)
K = 3    # kernel_size (odd -> 'same' padding is symmetric)
PAD = (K - 1) // 2
EE = E * E
BS = B * S
EPS = 1e-5  # PyTorch LayerNorm default

assert E & (E - 1) == 0      # power-of-two spatial dim (bit-mask column extraction)
assert K % 2 == 1
assert B == 2                # segmented LayerNorm below is written for 2 groups+


# ---- in-kernel math helpers ---------------------------------------------------
def _erf(z):
    # float32-accurate polynomial erf (Abramowitz & Stegun 7.1.26, |err| < 1.5e-7).
    # Exact divide (the previous approx reciprocal here caused the test failure).
    p = 0.3275911
    a1, a2, a3, a4, a5 = (0.254829592, -0.284496736, 1.421413741,
                          -1.453152027, 1.061405429)
    az = jnp.abs(z)
    t = 1.0 / (1.0 + p * az)
    poly = ((((a5 * t + a4) * t + a3) * t + a2) * t + a1) * t
    y = 1.0 - poly * jnp.exp(-az * az)
    return jnp.where(z >= 0, y, -y)


def _gelu(x):
    # Exact (erf-based) GELU, matching nn.GELU()'s default.
    return 0.5 * x * (1.0 + _erf(x * 0.7071067811865476))


def _rsqrt(a):
    # rsqrt + one Newton step: full f32 precision independent of HW approx bits.
    y = lax.rsqrt(a)
    return y * (1.5 - 0.5 * a * y * y)


# ---- kernel: whole problem in one invocation ----------------------------------
def convmixer_kernel(x_ref, wdw_ref, bias_ref, ln_ref, wpw_ref, o_ref):
    x = x_ref[...]                                      # (B*S, E*E) lane-dense f32

    # Index helpers & hoisted boundary predicates (built once, reused by all taps).
    lane = lax.broadcasted_iota(jnp.int32, (BS, EE), 1)
    col = jnp.bitwise_and(lane, E - 1)                  # column within a spatial row
    row_ok = {0: None}
    col_ok = {0: None}
    for d in range(1, PAD + 1):
        row_ok[-d] = lane >= d * E                      # source row >= 0
        row_ok[d] = lane < (E - d) * E                  # source row <= E-1
        col_ok[-d] = col >= d                           # source col >= 0
        col_ok[d] = col < E - d                         # source col <= E-1

    def tap(dh, dw):
        # value of x at spatial offset (dh, dw), zero outside the image.
        d = dh * E + dw
        t = x if d == 0 else pltpu.roll(x, shift=(-d) % EE, axis=1)
        m = row_ok[dh]
        if col_ok[dw] is not None:
            m = col_ok[dw] if m is None else (m & col_ok[dw])
        return t if m is None else jnp.where(m, t, 0.0)

    # ---- depthwise KxK 'same' conv (groups=S) + bias + GELU ----
    acc = jnp.zeros((BS, EE), jnp.float32)
    for kh in range(K):
        for kw in range(K):
            acc = acc + wdw_ref[kh * K + kw] * tap(kh - PAD, kw - PAD)
    h1 = _gelu(acc + bias_ref[0])                       # bias (B*S,1) splats over lanes

    # ---- segmented LayerNorm: stats over each batch element's (S,E,E) slab ----
    row = lax.broadcasted_iota(jnp.int32, (BS, EE), 0)
    group_masks = [(row >= b * S) & (row < (b + 1) * S) for b in range(B)]
    inv_n = 1.0 / (S * EE)

    def layernorm(h, gamma, beta):
        hsq = h * h
        mu = jnp.zeros_like(h)
        r = jnp.zeros_like(h)
        for gm in group_masks:                          # B masked lane+sublane reductions
            m_b = jnp.sum(jnp.where(gm, h, 0.0)) * inv_n
            e2_b = jnp.sum(jnp.where(gm, hsq, 0.0)) * inv_n
            r_b = _rsqrt(e2_b - m_b * m_b + EPS)        # one-pass variance (f32, small slabs)
            mu = jnp.where(gm, m_b, mu)
            r = jnp.where(gm, r_b, r)
        return (h - mu) * r * gamma + beta

    u = x + layernorm(h1, ln_ref[0], ln_ref[1])

    # ---- pointwise 1x1 conv: one (B*S,B*S) block-diagonal @ (B*S,E*E) MXU dot ----
    pw = jnp.dot(wpw_ref[...], u, preferred_element_type=jnp.float32) + bias_ref[1]
    h2 = _gelu(pw)

    # ---- LayerNorm + residual ----
    o_ref[...] = u + layernorm(h2, ln_ref[2], ln_ref[3])


# ---- wrapper --------------------------------------------------------------------
@jax.jit
def convmixer_block(x, wdw, bdw, g1, be1, w1, b1, g2, be2):
    # Fold batch into the sublane axis: (B, S, E, E) -> (B*S, E*E); all reshapes
    # / tiles below are layout glue outside the kernel.
    xf = x.reshape(BS, EE)

    # depthwise weight (S,1,K,K) -> (K*K, B*S, 1): leading-axis tap index in-kernel
    wdw_t = jnp.tile(wdw.reshape(S, K * K).T, (1, B)).reshape(K * K, BS, 1)
    # biases packed: [0]=depthwise, [1]=pointwise, each tiled over batch -> (2, B*S, 1)
    bias_t = jnp.stack([jnp.tile(bdw, B), jnp.tile(b1, B)]).reshape(2, BS, 1)
    # LN params packed: [g1, be1, g2, be2], each tiled over batch -> (4, B*S, E*E)
    ln_t = jnp.stack([jnp.tile(p.reshape(S, EE), (B, 1))
                      for p in (g1, be1, g2, be2)])
    # pointwise 1x1 weight (S,S,1,1) -> block-diagonal (B*S, B*S)
    w_bd = jnp.kron(jnp.eye(B, dtype=jnp.float32), w1.reshape(S, S))

    out = pl.pallas_call(
        convmixer_kernel,
        out_shape=jax.ShapeDtypeStruct((BS, EE), jnp.float32),
        in_specs=[pl.BlockSpec(memory_space=pltpu.MemorySpace.VMEM)] * 5,
        out_specs=pl.BlockSpec(memory_space=pltpu.MemorySpace.VMEM),
    )(xf, wdw_t, bias_t, ln_t, w_bd)
    return out.reshape(B, S, E, E)


# ---- pure-JAX reference (matches the PyTorch module) ------------------------------
def reference(x, wdw, bdw, g1, be1, w1, b1, g2, be2):
    from jax.scipy.special import erf

    def gelu(v):
        return 0.5 * v * (1.0 + erf(v * 0.7071067811865476))

    def ln(h, g, b):
        mu = jnp.mean(h, axis=(1, 2, 3), keepdims=True)
        var = jnp.mean((h - mu) ** 2, axis=(1, 2, 3), keepdims=True)
        return (h - mu) / jnp.sqrt(var + EPS) * g[None] + b[None]

    xp = jnp.pad(x, ((0, 0), (0, 0), (PAD, PAD), (PAD, PAD)))
    w3 = wdw.reshape(S, K, K)
    dw = jnp.zeros_like(x)
    for kh in range(K):
        for kw in range(K):
            dw = dw + w3[None, :, kh, kw, None, None] * xp[:, :, kh:kh + E, kw:kw + E]
    dw = dw + bdw[None, :, None, None]
    u = x + ln(gelu(dw), g1, be1)
    pw = jnp.einsum('oi,bihw->bohw', w1.reshape(S, S), u) + b1[None, :, None, None]
    return u + ln(gelu(pw), g2, be2)


if __name__ == "__main__":
    key = jax.random.PRNGKey(0)
    k1, k2, k3, k4, k5, k6, k7, k8, kx = jax.random.split(key, 9)

    # Deterministic synthetic parameters (shapes match the nn.Module's layers).
    wdw = jax.random.normal(k1, (S, 1, K, K), jnp.float32) * 0.2   # Conv2d(S,S,K,groups=S).weight
    bdw = jax.random.normal(k2, (S,), jnp.float32) * 0.1           # its bias
    g1 = 1.0 + 0.1 * jax.random.normal(k5, (S, E, E), jnp.float32) # LayerNorm([S,E,E]).weight
    be1 = 0.1 * jax.random.normal(k6, (S, E, E), jnp.float32)      # LayerNorm([S,E,E]).bias
    w1 = jax.random.normal(k3, (S, S, 1, 1), jnp.float32) * 0.2    # Conv2d(S,S,1).weight
    b1 = jax.random.normal(k4, (S,), jnp.float32) * 0.1            # its bias
    g2 = 1.0 + 0.1 * jax.random.normal(k7, (S, E, E), jnp.float32)
    be2 = 0.1 * jax.random.normal(k8, (S, E, E), jnp.float32)

    x = jax.random.normal(kx, (B, S, E, E), jnp.float32)

    out = jax.block_until_ready(convmixer_block(x, wdw, bdw, g1, be1, w1, b1, g2, be2))
    ref = jax.block_until_ready(reference(x, wdw, bdw, g1, be1, w1, b1, g2, be2))

    # All approximate hardware paths were removed; remaining differences are
    # f32 summation-order / polynomial-erf level (~1e-5), so 2e-3 is ample slack
    # while still catching any real indexing / masking / LN bug.
    np.testing.assert_allclose(np.asarray(out), np.asarray(ref), rtol=2e-3, atol=2e-3)

    print("KERNEL_OK")
</pallas_src>

<mosaic_0001>
module attributes {stable_mosaic.version = 11 : i64} {
  func.func @convmixer_kernel(%arg0: memref<8x256xf32, #tpu.memory_space<vmem>>, %arg1: memref<9x8x1xf32, #tpu.memory_space<vmem>>, %arg2: memref<2x8x1xf32, #tpu.memory_space<vmem>>, %arg3: memref<4x8x256xf32, #tpu.memory_space<vmem>>, %arg4: memref<8x8xf32, #tpu.memory_space<vmem>>, %arg5: memref<8x256xf32, #tpu.memory_space<vmem>>) attributes {dimension_semantics = [], scalar_prefetch = 0 : i64, scratch_operands = 0 : i64, tpu.core_type = #tpu.core_type<tc>} {
    %c0 = arith.constant 0 : index
    %c0_0 = arith.constant 0 : index
    %0 = vector.load %arg0[%c0, %c0_0] : memref<8x256xf32, #tpu.memory_space<vmem>>, vector<8x256xf32>
    %1 = tpu.iota {dimensions = array<i32: 1>} : vector<8x256xi32>
    %c15_i32 = arith.constant 15 : i32
    %2 = vector.broadcast %c15_i32 : i32 to vector<8x256xi32>
    %3 = arith.andi %1, %2 : vector<8x256xi32>
    %c16_i32 = arith.constant 16 : i32
    %4 = vector.broadcast %c16_i32 : i32 to vector<8x256xi32>
    %5 = arith.cmpi sge, %1, %4 : vector<8x256xi32>
    %c240_i32 = arith.constant 240 : i32
    %6 = vector.broadcast %c240_i32 : i32 to vector<8x256xi32>
    %7 = arith.cmpi slt, %1, %6 : vector<8x256xi32>
    %c1_i32 = arith.constant 1 : i32
    %8 = vector.broadcast %c1_i32 : i32 to vector<8x256xi32>
    %9 = arith.cmpi sge, %3, %8 : vector<8x256xi32>
    %c15_i32_1 = arith.constant 15 : i32
    %10 = vector.broadcast %c15_i32_1 : i32 to vector<8x256xi32>
    %11 = arith.cmpi slt, %3, %10 : vector<8x256xi32>
    %cst = arith.constant 0.000000e+00 : f32
    %12 = vector.broadcast %cst : f32 to vector<8x256xf32>
    %c0_2 = arith.constant 0 : index
    %c0_3 = arith.constant 0 : index
    %c0_4 = arith.constant 0 : index
    %13 = vector.load %arg1[%c0_2, %c0_3, %c0_4] : memref<9x8x1xf32, #tpu.memory_space<vmem>>, vector<1x8x1xf32>
    %14 = vector.shape_cast %13 : vector<1x8x1xf32> to vector<8x1xf32>
    %c17_i32 = arith.constant 17 : i32
    %15 = tpu.dynamic_rotate %0 by %c17_i32 dim 1 : vector<8x256xf32>, i32 -> vector<8x256xf32>
    %16 = arith.andi %5, %9 : vector<8x256xi1>
    %cst_5 = arith.constant 0.000000e+00 : f32
    %17 = vector.broadcast %cst_5 : f32 to vector<8x256xf32>
    %18 = arith.select %16, %15, %17 : vector<8x256xi1>, vector<8x256xf32>
    %19 = vector.broadcast %14 : vector<8x1xf32> to vector<8x256xf32>
    %20 = arith.mulf %19, %18 : vector<8x256xf32>
    %21 = arith.addf %12, %20 : vector<8x256xf32>
    %c1 = arith.constant 1 : index
    %c0_6 = arith.constant 0 : index
    %c0_7 = arith.constant 0 : index
    %22 = vector.load %arg1[%c1, %c0_6, %c0_7] : memref<9x8x1xf32, #tpu.memory_space<vmem>>, vector<1x8x1xf32>
    %23 = vector.shape_cast %22 : vector<1x8x1xf32> to vector<8x1xf32>
    %c16_i32_8 = arith.constant 16 : i32
    %24 = tpu.dynamic_rotate %0 by %c16_i32_8 dim 1 : vector<8x256xf32>, i32 -> vector<8x256xf32>
    %cst_9 = arith.constant 0.000000e+00 : f32
    %25 = vector.broadcast %cst_9 : f32 to vector<8x256xf32>
    %26 = arith.select %5, %24, %25 : vector<8x256xi1>, vector<8x256xf32>
    %27 = vector.broadcast %23 : vector<8x1xf32> to vector<8x256xf32>
    %28 = arith.mulf %27, %26 : vector<8x256xf32>
    %29 = arith.addf %21, %28 : vector<8x256xf32>
    %c2 = arith.constant 2 : index
    %c0_10 = arith.constant 0 : index
    %c0_11 = arith.constant 0 : index
    %30 = vector.load %arg1[%c2, %c0_10, %c0_11] : memref<9x8x1xf32, #tpu.memory_space<vmem>>, vector<1x8x1xf32>
    %31 = vector.shape_cast %30 : vector<1x8x1xf32> to vector<8x1xf32>
    %c15_i32_12 = arith.constant 15 : i32
    %32 = tpu.dynamic_rotate %0 by %c15_i32_12 dim 1 : vector<8x256xf32>, i32 -> vector<8x256xf32>
    %33 = arith.andi %5, %11 : vector<8x256xi1>
    %cst_13 = arith.constant 0.000000e+00 : f32
    %34 = vector.broadcast %cst_13 : f32 to vector<8x256xf32>
    %35 = arith.select %33, %32, %34 : vector<8x256xi1>, vector<8x256xf32>
    %36 = vector.broadcast %31 : vector<8x1xf32> to vector<8x256xf32>
    %37 = arith.mulf %36, %35 : vector<8x256xf32>
    %38 = arith.addf %29, %37 : vector<8x256xf32>
    %c3 = arith.constant 3 : index
    %c0_14 = arith.constant 0 : index
    %c0_15 = arith.constant 0 : index
    %39 = vector.load %arg1[%c3, %c0_14, %c0_15] : memref<9x8x1xf32, #tpu.memory_space<vmem>>, vector<1x8x1xf32>
    %40 = vector.shape_cast %39 : vector<1x8x1xf32> to vector<8x1xf32>
    %c1_i32_16 = arith.constant 1 : i32
    %41 = tpu.dynamic_rotate %0 by %c1_i32_16 dim 1 : vector<8x256xf32>, i32 -> vector<8x256xf32>
    %cst_17 = arith.constant 0.000000e+00 : f32
    %42 = vector.broadcast %cst_17 : f32 to vector<8x256xf32>
    %43 = arith.select %9, %41, %42 : vector<8x256xi1>, vector<8x256xf32>
    %44 = vector.broadcast %40 : vector<8x1xf32> to vector<8x256xf32>
    %45 = arith.mulf %44, %43 : vector<8x256xf32>
    %46 = arith.addf %38, %45 : vector<8x256xf32>
    %c4 = arith.constant 4 : index
    %c0_18 = arith.constant 0 : index
    %c0_19 = arith.constant 0 : index
    %47 = vector.load %arg1[%c4, %c0_18, %c0_19] : memref<9x8x1xf32, #tpu.memory_space<vmem>>, vector<1x8x1xf32>
    %48 = vector.shape_cast %47 : vector<1x8x1xf32> to vector<8x1xf32>
    %49 = vector.broadcast %48 : vector<8x1xf32> to vector<8x256xf32>
    %50 = arith.mulf %49, %0 : vector<8x256xf32>
    %51 = arith.addf %46, %50 : vector<8x256xf32>
    %c5 = arith.constant 5 : index
    %c0_20 = arith.constant 0 : index
    %c0_21 = arith.constant 0 : index
    %52 = vector.load %arg1[%c5, %c0_20, %c0_21] : memref<9x8x1xf32, #tpu.memory_space<vmem>>, vector<1x8x1xf32>
    %53 = vector.shape_cast %52 : vector<1x8x1xf32> to vector<8x1xf32>
    %c255_i32 = arith.constant 255 : i32
    %54 = tpu.dynamic_rotate %0 by %c255_i32 dim 1 : vector<8x256xf32>, i32 -> vector<8x256xf32>
    %cst_22 = arith.constant 0.000000e+00 : f32
    %55 = vector.broadcast %cst_22 : f32 to vector<8x256xf32>
    %56 = arith.select %11, %54, %55 : vector<8x256xi1>, vector<8x256xf32>
    %57 = vector.broadcast %53 : vector<8x1xf32> to vector<8x256xf32>
    %58 = arith.mulf %57, %56 : vector<8x256xf32>
    %59 = arith.addf %51, %58 : vector<8x256xf32>
    %c6 = arith.constant 6 : index
    %c0_23 = arith.constant 0 : index
    %c0_24 = arith.constant 0 : index
    %60 = vector.load %arg1[%c6, %c0_23, %c0_24] : memref<9x8x1xf32, #tpu.memory_space<vmem>>, vector<1x8x1xf32>
    %61 = vector.shape_cast %60 : vector<1x8x1xf32> to vector<8x1xf32>
    %c241_i32 = arith.constant 241 : i32
    %62 = tpu.dynamic_rotate %0 by %c241_i32 dim 1 : vector<8x256xf32>, i32 -> vector<8x256xf32>
    %63 = arith.andi %7, %9 : vector<8x256xi1>
    %cst_25 = arith.constant 0.000000e+00 : f32
    %64 = vector.broadcast %cst_25 : f32 to vector<8x256xf32>
    %65 = arith.select %63, %62, %64 : vector<8x256xi1>, vector<8x256xf32>
    %66 = vector.broadcast %61 : vector<8x1xf32> to vector<8x256xf32>
    %67 = arith.mulf %66, %65 : vector<8x256xf32>
    %68 = arith.addf %59, %67 : vector<8x256xf32>
    %c7 = arith.constant 7 : index
    %c0_26 = arith.constant 0 : index
    %c0_27 = arith.constant 0 : index
    %69 = vector.load %arg1[%c7, %c0_26, %c0_27] : memref<9x8x1xf32, #tpu.memory_space<vmem>>, vector<1x8x1xf32>
    %70 = vector.shape_cast %69 : vector<1x8x1xf32> to vector<8x1xf32>
    %c240_i32_28 = arith.constant 240 : i32
    %71 = tpu.dynamic_rotate %0 by %c240_i32_28 dim 1 : vector<8x256xf32>, i32 -> vector<8x256xf32>
    %cst_29 = arith.constant 0.000000e+00 : f32
    %72 = vector.broadcast %cst_29 : f32 to vector<8x256xf32>
    %73 = arith.select %7, %71, %72 : vector<8x256xi1>, vector<8x256xf32>
    %74 = vector.broadcast %70 : vector<8x1xf32> to vector<8x256xf32>
    %75 = arith.mulf %74, %73 : vector<8x256xf32>
    %76 = arith.addf %68, %75 : vector<8x256xf32>
    %c8 = arith.constant 8 : index
    %c0_30 = arith.constant 0 : index
    %c0_31 = arith.constant 0 : index
    %77 = vector.load %arg1[%c8, %c0_30, %c0_31] : memref<9x8x1xf32, #tpu.memory_space<vmem>>, vector<1x8x1xf32>
    %78 = vector.shape_cast %77 : vector<1x8x1xf32> to vector<8x1xf32>
    %c239_i32 = arith.constant 239 : i32
    %79 = tpu.dynamic_rotate %0 by %c239_i32 dim 1 : vector<8x256xf32>, i32 -> vector<8x256xf32>
    %80 = arith.andi %7, %11 : vector<8x256xi1>
    %cst_32 = arith.constant 0.000000e+00 : f32
    %81 = vector.broadcast %cst_32 : f32 to vector<8x256xf32>
    %82 = arith.select %80, %79, %81 : vector<8x256xi1>, vector<8x256xf32>
    %83 = vector.broadcast %78 : vector<8x1xf32> to vector<8x256xf32>
    %84 = arith.mulf %83, %82 : vector<8x256xf32>
    %85 = arith.addf %76, %84 : vector<8x256xf32>
    %c0_33 = arith.constant 0 : index
    %c0_34 = arith.constant 0 : index
    %c0_35 = arith.constant 0 : index
    %86 = vector.load %arg2[%c0_33, %c0_34, %c0_35] : memref<2x8x1xf32, #tpu.memory_space<vmem>>, vector<1x8x1xf32>
    %87 = vector.shape_cast %86 : vector<1x8x1xf32> to vector<8x1xf32>
    %88 = vector.broadcast %87 : vector<8x1xf32> to vector<8x256xf32>
    %89 = arith.addf %85, %88 : vector<8x256xf32>
    %cst_36 = arith.constant 5.000000e-01 : f32
    %90 = vector.broadcast %cst_36 : f32 to vector<8x256xf32>
    %91 = arith.mulf %90, %89 : vector<8x256xf32>
    %cst_37 = arith.constant 0.707106769 : f32
    %92 = vector.broadcast %cst_37 : f32 to vector<8x256xf32>
    %93 = arith.mulf %89, %92 : vector<8x256xf32>
    %94 = math.absf %93 : vector<8x256xf32>
    %cst_38 = arith.constant 0.327591091 : f32
    %95 = vector.broadcast %cst_38 : f32 to vector<8x256xf32>
    %96 = arith.mulf %95, %94 : vector<8x256xf32>
    %cst_39 = arith.constant 1.000000e+00 : f32
    %97 = vector.broadcast %cst_39 : f32 to vector<8x256xf32>
    %98 = arith.addf %97, %96 : vector<8x256xf32>
    %cst_40 = arith.constant 1.000000e+00 : f32
    %99 = vector.broadcast %cst_40 : f32 to vector<8x256xf32>
    %100 = arith.divf %99, %98 : vector<8x256xf32>
    %cst_41 = arith.constant 1.06140542 : f32
    %101 = vector.broadcast %cst_41 : f32 to vector<8x256xf32>
    %102 = arith.mulf %101, %100 : vector<8x256xf32>
    %cst_42 = arith.constant -1.45315206 : f32
    %103 = vector.broadcast %cst_42 : f32 to vector<8x256xf32>
    %104 = arith.addf %102, %103 : vector<8x256xf32>
    %105 = arith.mulf %104, %100 : vector<8x256xf32>
    %cst_43 = arith.constant 1.42141378 : f32
    %106 = vector.broadcast %cst_43 : f32 to vector<8x256xf32>
    %107 = arith.addf %105, %106 : vector<8x256xf32>
    %108 = arith.mulf %107, %100 : vector<8x256xf32>
    %cst_44 = arith.constant -0.284496725 : f32
    %109 = vector.broadcast %cst_44 : f32 to vector<8x256xf32>
    %110 = arith.addf %108, %109 : vector<8x256xf32>
    %111 = arith.mulf %110, %100 : vector<8x256xf32>
    %cst_45 = arith.constant 0.254829586 : f32
    %112 = vector.broadcast %cst_45 : f32 to vector<8x256xf32>
    %113 = arith.addf %111, %112 : vector<8x256xf32>
    %114 = arith.mulf %113, %100 : vector<8x256xf32>
    %cst_46 = arith.constant 0.000000e+00 : f32
    %115 = vector.broadcast %cst_46 : f32 to vector<8x256xf32>
    %116 = arith.subf %115, %94 : vector<8x256xf32>
    %117 = arith.mulf %116, %94 : vector<8x256xf32>
    %118 = math.exp %117 : vector<8x256xf32>
    %119 = arith.mulf %114, %118 : vector<8x256xf32>
    %cst_47 = arith.constant 1.000000e+00 : f32
    %120 = vector.broadcast %cst_47 : f32 to vector<8x256xf32>
    %121 = arith.subf %120, %119 : vector<8x256xf32>
    %cst_48 = arith.constant 0.000000e+00 : f32
    %122 = vector.broadcast %cst_48 : f32 to vector<8x256xf32>
    %123 = arith.cmpf oge, %93, %122 : vector<8x256xf32>
    %cst_49 = arith.constant 0.000000e+00 : f32
    %124 = vector.broadcast %cst_49 : f32 to vector<8x256xf32>
    %125 = arith.subf %124, %121 : vector<8x256xf32>
    %126 = arith.select %123, %121, %125 : vector<8x256xi1>, vector<8x256xf32>
    %cst_50 = arith.constant 1.000000e+00 : f32
    %127 = vector.broadcast %cst_50 : f32 to vector<8x256xf32>
    %128 = arith.addf %127, %126 : vector<8x256xf32>
    %129 = arith.mulf %91, %128 : vector<8x256xf32>
    %130 = tpu.iota {dimensions = array<i32: 0>} : vector<8x256xi32>
    %c0_i32 = arith.constant 0 : i32
    %131 = vector.broadcast %c0_i32 : i32 to vector<8x256xi32>
    %132 = arith.cmpi sge, %130, %131 : vector<8x256xi32>
    %c4_i32 = arith.constant 4 : i32
    %133 = vector.broadcast %c4_i32 : i32 to vector<8x256xi32>
    %134 = arith.cmpi slt, %130, %133 : vector<8x256xi32>
    %135 = arith.andi %132, %134 : vector<8x256xi1>
    %c4_i32_51 = arith.constant 4 : i32
    %136 = vector.broadcast %c4_i32_51 : i32 to vector<8x256xi32>
    %137 = arith.cmpi sge, %130, %136 : vector<8x256xi32>
    %c8_i32 = arith.constant 8 : i32
    %138 = vector.broadcast %c8_i32 : i32 to vector<8x256xi32>
    %139 = arith.cmpi slt, %130, %138 : vector<8x256xi32>
    %140 = arith.andi %137, %139 : vector<8x256xi1>
    %c0_52 = arith.constant 0 : index
    %c0_53 = arith.constant 0 : index
    %c0_54 = arith.constant 0 : index
    %141 = vector.load %arg3[%c0_52, %c0_53, %c0_54] : memref<4x8x256xf32, #tpu.memory_space<vmem>>, vector<1x8x256xf32>
    %142 = vector.shape_cast %141 : vector<1x8x256xf32> to vector<8x256xf32>
    %c1_55 = arith.constant 1 : index
    %c0_56 = arith.constant 0 : index
    %c0_57 = arith.constant 0 : index
    %143 = vector.load %arg3[%c1_55, %c0_56, %c0_57] : memref<4x8x256xf32, #tpu.memory_space<vmem>>, vector<1x8x256xf32>
    %144 = vector.shape_cast %143 : vector<1x8x256xf32> to vector<8x256xf32>
    %145 = arith.mulf %129, %129 : vector<8x256xf32>
    %cst_58 = arith.constant 0.000000e+00 : f32
    %146 = vector.broadcast %cst_58 : f32 to vector<8x256xf32>
    %cst_59 = arith.constant 0.000000e+00 : f32
    %147 = vector.broadcast %cst_59 : f32 to vector<8x256xf32>
    %cst_60 = arith.constant 0.000000e+00 : f32
    %148 = vector.broadcast %cst_60 : f32 to vector<8x256xf32>
    %149 = arith.select %135, %129, %148 : vector<8x256xi1>, vector<8x256xf32>
    %150 = vector.shape_cast %149 : vector<8x256xf32> to vector<1x8x256xf32>
    %cst_61 = arith.constant dense<0.000000e+00> : vector<1xf32>
    %151 = vector.multi_reduction <add>, %150, %cst_61 [1, 2] : vector<1x8x256xf32> to vector<1xf32>
    %152 = vector.shape_cast %151 : vector<1xf32> to vector<1x1x1xf32>
    %153 = vector.extract %152[0, 0, 0] : f32 from vector<1x1x1xf32>
    %cst_62 = arith.constant 9.765625E-4 : f32
    %154 = arith.mulf %153, %cst_62 : f32
    %cst_63 = arith.constant 0.000000e+00 : f32
    %155 = vector.broadcast %cst_63 : f32 to vector<8x256xf32>
    %156 = arith.select %135, %145, %155 : vector<8x256xi1>, vector<8x256xf32>
    %157 = vector.shape_cast %156 : vector<8x256xf32> to vector<1x8x256xf32>
    %cst_64 = arith.constant dense<0.000000e+00> : vector<1xf32>
    %158 = vector.multi_reduction <add>, %157, %cst_64 [1, 2] : vector<1x8x256xf32> to vector<1xf32>
    %159 = vector.shape_cast %158 : vector<1xf32> to vector<1x1x1xf32>
    %160 = vector.extract %159[0, 0, 0] : f32 from vector<1x1x1xf32>
    %cst_65 = arith.constant 9.765625E-4 : f32
    %161 = arith.mulf %160, %cst_65 : f32
    %162 = arith.mulf %154, %154 : f32
    %163 = arith.subf %161, %162 : f32
    %cst_66 = arith.constant 9.99999974E-6 : f32
    %164 = arith.addf %163, %cst_66 : f32
    %165 = math.rsqrt %164 : f32
    %cst_67 = arith.constant 5.000000e-01 : f32
    %166 = arith.mulf %cst_67, %164 : f32
    %167 = arith.mulf %166, %165 : f32
    %168 = arith.mulf %167, %165 : f32
    %cst_68 = arith.constant 1.500000e+00 : f32
    %169 = arith.subf %cst_68, %168 : f32
    %170 = arith.mulf %165, %169 : f32
    %171 = vector.broadcast %154 : f32 to vector<8x256xf32>
    %172 = arith.select %135, %171, %146 : vector<8x256xi1>, vector<8x256xf32>
    %173 = vector.broadcast %170 : f32 to vector<8x256xf32>
    %174 = arith.select %135, %173, %147 : vector<8x256xi1>, vector<8x256xf32>
    %cst_69 = arith.constant 0.000000e+00 : f32
    %175 = vector.broadcast %cst_69 : f32 to vector<8x256xf32>
    %176 = arith.select %140, %129, %175 : vector<8x256xi1>, vector<8x256xf32>
    %177 = vector.shape_cast %176 : vector<8x256xf32> to vector<1x8x256xf32>
    %cst_70 = arith.constant dense<0.000000e+00> : vector<1xf32>
    %178 = vector.multi_reduction <add>, %177, %cst_70 [1, 2] : vector<1x8x256xf32> to vector<1xf32>
    %179 = vector.shape_cast %178 : vector<1xf32> to vector<1x1x1xf32>
    %180 = vector.extract %179[0, 0, 0] : f32 from vector<1x1x1xf32>
    %cst_71 = arith.constant 9.765625E-4 : f32
    %181 = arith.mulf %180, %cst_71 : f32
    %cst_72 = arith.constant 0.000000e+00 : f32
    %182 = vector.broadcast %cst_72 : f32 to vector<8x256xf32>
    %183 = arith.select %140, %145, %182 : vector<8x256xi1>, vector<8x256xf32>
    %184 = vector.shape_cast %183 : vector<8x256xf32> to vector<1x8x256xf32>
    %cst_73 = arith.constant dense<0.000000e+00> : vector<1xf32>
    %185 = vector.multi_reduction <add>, %184, %cst_73 [1, 2] : vector<1x8x256xf32> to vector<1xf32>
    %186 = vector.shape_cast %185 : vector<1xf32> to vector<1x1x1xf32>
    %187 = vector.extract %186[0, 0, 0] : f32 from vector<1x1x1xf32>
    %cst_74 = arith.constant 9.765625E-4 : f32
    %188 = arith.mulf %187, %cst_74 : f32
    %189 = arith.mulf %181, %181 : f32
    %190 = arith.subf %188, %189 : f32
    %cst_75 = arith.constant 9.99999974E-6 : f32
    %191 = arith.addf %190, %cst_75 : f32
    %192 = math.rsqrt %191 : f32
    %cst_76 = arith.constant 5.000000e-01 : f32
    %193 = arith.mulf %cst_76, %191 : f32
    %194 = arith.mulf %193, %192 : f32
    %195 = arith.mulf %194, %192 : f32
    %cst_77 = arith.constant 1.500000e+00 : f32
    %196 = arith.subf %cst_77, %195 : f32
    %197 = arith.mulf %192, %196 : f32
    %198 = vector.broadcast %181 : f32 to vector<8x256xf32>
    %199 = arith.select %140, %198, %172 : vector<8x256xi1>, vector<8x256xf32>
    %200 = vector.broadcast %197 : f32 to vector<8x256xf32>
    %201 = arith.select %140, %200, %174 : vector<8x256xi1>, vector<8x256xf32>
    %202 = arith.subf %129, %199 : vector<8x256xf32>
    %203 = arith.mulf %202, %201 : vector<8x256xf32>
    %204 = arith.mulf %203, %142 : vector<8x256xf32>
    %205 = arith.addf %204, %144 : vector<8x256xf32>
    %206 = arith.addf %0, %205 : vector<8x256xf32>
    %c0_78 = arith.constant 0 : index
    %c0_79 = arith.constant 0 : index
    %207 = vector.load %arg4[%c0_78, %c0_79] : memref<8x8xf32, #tpu.memory_space<vmem>>, vector<8x8xf32>
    %cst_80 = arith.constant dense<0.000000e+00> : vector<8x256xf32>
    %208 = tpu.matmul %207, %206, %cst_80 {dimension_numbers = #tpu.dot_dimension_numbers<[1], [0], [0], [1], [0, 0, 1, 1], [], []>} : vector<8x8xf32>, vector<8x256xf32>, vector<8x256xf32> -> vector<8x256xf32>
    %c1_81 = arith.constant 1 : index
    %c0_82 = arith.constant 0 : index
    %c0_83 = arith.constant 0 : index
    %209 = vector.load %arg2[%c1_81, %c0_82, %c0_83] : memref<2x8x1xf32, #tpu.memory_space<vmem>>, vector<1x8x1xf32>
    %210 = vector.shape_cast %209 : vector<1x8x1xf32> to vector<8x1xf32>
    %211 = vector.broadcast %210 : vector<8x1xf32> to vector<8x256xf32>
    %212 = arith.addf %208, %211 : vector<8x256xf32>
    %cst_84 = arith.constant 5.000000e-01 : f32
    %213 = vector.broadcast %cst_84 : f32 to vector<8x256xf32>
    %214 = arith.mulf %213, %212 : vector<8x256xf32>
    %cst_85 = arith.constant 0.707106769 : f32
    %215 = vector.broadcast %cst_85 : f32 to vector<8x256xf32>
    %216 = arith.mulf %212, %215 : vector<8x256xf32>
    %217 = math.absf %216 : vector<8x256xf32>
    %cst_86 = arith.constant 0.327591091 : f32
    %218 = vector.broadcast %cst_86 : f32 to vector<8x256xf32>
    %219 = arith.mulf %218, %217 : vector<8x256xf32>
    %cst_87 = arith.constant 1.000000e+00 : f32
    %220 = vector.broadcast %cst_87 : f32 to vector<8x256xf32>
    %221 = arith.addf %220, %219 : vector<8x256xf32>
    %cst_88 = arith.constant 1.000000e+00 : f32
    %222 = vector.broadcast %cst_88 : f32 to vector<8x256xf32>
    %223 = arith.divf %222, %221 : vector<8x256xf32>
    %cst_89 = arith.constant 1.06140542 : f32
    %224 = vector.broadcast %cst_89 : f32 to vector<8x256xf32>
    %225 = arith.mulf %224, %223 : vector<8x256xf32>
    %cst_90 = arith.constant -1.45315206 : f32
    %226 = vector.broadcast %cst_90 : f32 to vector<8x256xf32>
    %227 = arith.addf %225, %226 : vector<8x256xf32>
    %228 = arith.mulf %227, %223 : vector<8x256xf32>
    %cst_91 = arith.constant 1.42141378 : f32
    %229 = vector.broadcast %cst_91 : f32 to vector<8x256xf32>
    %230 = arith.addf %228, %229 : vector<8x256xf32>
    %231 = arith.mulf %230, %223 : vector<8x256xf32>
    %cst_92 = arith.constant -0.284496725 : f32
    %232 = vector.broadcast %cst_92 : f32 to vector<8x256xf32>
    %233 = arith.addf %231, %232 : vector<8x256xf32>
    %234 = arith.mulf %233, %223 : vector<8x256xf32>
    %cst_93 = arith.constant 0.254829586 : f32
    %235 = vector.broadcast %cst_93 : f32 to vector<8x256xf32>
    %236 = arith.addf %234, %235 : vector<8x256xf32>
    %237 = arith.mulf %236, %223 : vector<8x256xf32>
    %cst_94 = arith.constant 0.000000e+00 : f32
    %238 = vector.broadcast %cst_94 : f32 to vector<8x256xf32>
    %239 = arith.subf %238, %217 : vector<8x256xf32>
    %240 = arith.mulf %239, %217 : vector<8x256xf32>
    %241 = math.exp %240 : vector<8x256xf32>
    %242 = arith.mulf %237, %241 : vector<8x256xf32>
    %cst_95 = arith.constant 1.000000e+00 : f32
    %243 = vector.broadcast %cst_95 : f32 to vector<8x256xf32>
    %244 = arith.subf %243, %242 : vector<8x256xf32>
    %cst_96 = arith.constant 0.000000e+00 : f32
    %245 = vector.broadcast %cst_96 : f32 to vector<8x256xf32>
    %246 = arith.cmpf oge, %216, %245 : vector<8x256xf32>
    %cst_97 = arith.constant 0.000000e+00 : f32
    %247 = vector.broadcast %cst_97 : f32 to vector<8x256xf32>
    %248 = arith.subf %247, %244 : vector<8x256xf32>
    %249 = arith.select %246, %244, %248 : vector<8x256xi1>, vector<8x256xf32>
    %cst_98 = arith.constant 1.000000e+00 : f32
    %250 = vector.broadcast %cst_98 : f32 to vector<8x256xf32>
    %251 = arith.addf %250, %249 : vector<8x256xf32>
    %252 = arith.mulf %214, %251 : vector<8x256xf32>
    %c2_99 = arith.constant 2 : index
    %c0_100 = arith.constant 0 : index
    %c0_101 = arith.constant 0 : index
    %253 = vector.load %arg3[%c2_99, %c0_100, %c0_101] : memref<4x8x256xf32, #tpu.memory_space<vmem>>, vector<1x8x256xf32>
    %254 = vector.shape_cast %253 : vector<1x8x256xf32> to vector<8x256xf32>
    %c3_102 = arith.constant 3 : index
    %c0_103 = arith.constant 0 : index
    %c0_104 = arith.constant 0 : index
    %255 = vector.load %arg3[%c3_102, %c0_103, %c0_104] : memref<4x8x256xf32, #tpu.memory_space<vmem>>, vector<1x8x256xf32>
    %256 = vector.shape_cast %255 : vector<1x8x256xf32> to vector<8x256xf32>
    %257 = arith.mulf %252, %252 : vector<8x256xf32>
    %cst_105 = arith.constant 0.000000e+00 : f32
    %258 = vector.broadcast %cst_105 : f32 to vector<8x256xf32>
    %cst_106 = arith.constant 0.000000e+00 : f32
    %259 = vector.broadcast %cst_106 : f32 to vector<8x256xf32>
    %cst_107 = arith.constant 0.000000e+00 : f32
    %260 = vector.broadcast %cst_107 : f32 to vector<8x256xf32>
    %261 = arith.select %135, %252, %260 : vector<8x256xi1>, vector<8x256xf32>
    %262 = vector.shape_cast %261 : vector<8x256xf32> to vector<1x8x256xf32>
    %cst_108 = arith.constant dense<0.000000e+00> : vector<1xf32>
    %263 = vector.multi_reduction <add>, %262, %cst_108 [1, 2] : vector<1x8x256xf32> to vector<1xf32>
    %264 = vector.shape_cast %263 : vector<1xf32> to vector<1x1x1xf32>
    %265 = vector.extract %264[0, 0, 0] : f32 from vector<1x1x1xf32>
    %cst_109 = arith.constant 9.765625E-4 : f32
    %266 = arith.mulf %265, %cst_109 : f32
    %cst_110 = arith.constant 0.000000e+00 : f32
    %267 = vector.broadcast %cst_110 : f32 to vector<8x256xf32>
    %268 = arith.select %135, %257, %267 : vector<8x256xi1>, vector<8x256xf32>
    %269 = vector.shape_cast %268 : vector<8x256xf32> to vector<1x8x256xf32>
    %cst_111 = arith.constant dense<0.000000e+00> : vector<1xf32>
    %270 = vector.multi_reduction <add>, %269, %cst_111 [1, 2] : vector<1x8x256xf32> to vector<1xf32>
    %271 = vector.shape_cast %270 : vector<1xf32> to vector<1x1x1xf32>
    %272 = vector.extract %271[0, 0, 0] : f32 from vector<1x1x1xf32>
    %cst_112 = arith.constant 9.765625E-4 : f32
    %273 = arith.mulf %272, %cst_112 : f32
    %274 = arith.mulf %266, %266 : f32
    %275 = arith.subf %273, %274 : f32
    %cst_113 = arith.constant 9.99999974E-6 : f32
    %276 = arith.addf %275, %cst_113 : f32
    %277 = math.rsqrt %276 : f32
    %cst_114 = arith.constant 5.000000e-01 : f32
    %278 = arith.mulf %cst_114, %276 : f32
    %279 = arith.mulf %278, %277 : f32
    %280 = arith.mulf %279, %277 : f32
    %cst_115 = arith.constant 1.500000e+00 : f32
    %281 = arith.subf %cst_115, %280 : f32
    %282 = arith.mulf %277, %281 : f32
    %283 = vector.broadcast %266 : f32 to vector<8x256xf32>
    %284 = arith.select %135, %283, %258 : vector<8x256xi1>, vector<8x256xf32>
    %285 = vector.broadcast %282 : f32 to vector<8x256xf32>
    %286 = arith.select %135, %285, %259 : vector<8x256xi1>, vector<8x256xf32>
    %cst_116 = arith.constant 0.000000e+00 : f32
    %287 = vector.broadcast %cst_116 : f32 to vector<8x256xf32>
    %288 = arith.select %140, %252, %287 : vector<8x256xi1>, vector<8x256xf32>
    %289 = vector.shape_cast %288 : vector<8x256xf32> to vector<1x8x256xf32>
    %cst_117 = arith.constant dense<0.000000e+00> : vector<1xf32>
    %290 = vector.multi_reduction <add>, %289, %cst_117 [1, 2] : vector<1x8x256xf32> to vector<1xf32>
    %291 = vector.shape_cast %290 : vector<1xf32> to vector<1x1x1xf32>
    %292 = vector.extract %291[0, 0, 0] : f32 from vector<1x1x1xf32>
    %cst_118 = arith.constant 9.765625E-4 : f32
    %293 = arith.mulf %292, %cst_118 : f32
    %cst_119 = arith.constant 0.000000e+00 : f32
    %294 = vector.broadcast %cst_119 : f32 to vector<8x256xf32>
    %295 = arith.select %140, %257, %294 : vector<8x256xi1>, vector<8x256xf32>
    %296 = vector.shape_cast %295 : vector<8x256xf32> to vector<1x8x256xf32>
    %cst_120 = arith.constant dense<0.000000e+00> : vector<1xf32>
    %297 = vector.multi_reduction <add>, %296, %cst_120 [1, 2] : vector<1x8x256xf32> to vector<1xf32>
    %298 = vector.shape_cast %297 : vector<1xf32> to vector<1x1x1xf32>
    %299 = vector.extract %298[0, 0, 0] : f32 from vector<1x1x1xf32>
    %cst_121 = arith.constant 9.765625E-4 : f32
    %300 = arith.mulf %299, %cst_121 : f32
    %301 = arith.mulf %293, %293 : f32
    %302 = arith.subf %300, %301 : f32
    %cst_122 = arith.constant 9.99999974E-6 : f32
    %303 = arith.addf %302, %cst_122 : f32
    %304 = math.rsqrt %303 : f32
    %cst_123 = arith.constant 5.000000e-01 : f32
    %305 = arith.mulf %cst_123, %303 : f32
    %306 = arith.mulf %305, %304 : f32
    %307 = arith.mulf %306, %304 : f32
    %cst_124 = arith.constant 1.500000e+00 : f32
    %308 = arith.subf %cst_124, %307 : f32
    %309 = arith.mulf %304, %308 : f32
    %310 = vector.broadcast %293 : f32 to vector<8x256xf32>
    %311 = arith.select %140, %310, %284 : vector<8x256xi1>, vector<8x256xf32>
    %312 = vector.broadcast %309 : f32 to vector<8x256xf32>
    %313 = arith.select %140, %312, %286 : vector<8x256xi1>, vector<8x256xf32>
    %314 = arith.subf %252, %311 : vector<8x256xf32>
    %315 = arith.mulf %314, %313 : vector<8x256xf32>
    %316 = arith.mulf %315, %254 : vector<8x256xf32>
    %317 = arith.addf %316, %256 : vector<8x256xf32>
    %318 = arith.addf %206, %317 : vector<8x256xf32>
    %c0_125 = arith.constant 0 : index
    %c0_126 = arith.constant 0 : index
    %319 = vector.load %arg5[%c0_125, %c0_126] : memref<8x256xf32, #tpu.memory_space<vmem>>, vector<8x256xf32>
    tpu.vector_store %arg5[%c0_125, %c0_126], %318 {strides = array<i32>} : memref<8x256xf32, #tpu.memory_space<vmem>>, vector<8x256xf32>,
    return
  }
}

</mosaic_0001>

<bundles_post_ra>
// kernel: tile.39
= control target key start
LH: loop header
LB: loop body
LE: loop exit
PB: predicated region body
PF: predicated region fallthrough
CT: control target
= control target key end

     0   :  { %s22_s0 = inlined_call_operand.vmem [shape: f32[4], index: 0, kind: input, shape index: {}]   ;;  %s23_s1 = inlined_call_operand.vmem [shape: f32[2,4], index: 1, kind: output, shape index: {}]  }
   0x1   :  { %v4_v0 = vld [vmem:[%s22_s0] ss:$0 sm:$0xff] }
   0x2   :  { %5 = vst [vmem:[%s23_s1] sm:$0x3] %v4_v0 }

// kernel: tile.44
= control target key start
LH: loop header
LB: loop body
LE: loop exit
PB: predicated region body
PF: predicated region fallthrough
CT: control target
= control target key end

     0   :  { %vm7_vm0 = vcmask 31744   ;;  %vm13_vm1 = vcmask 64544   ;;  %s39_s0 = inlined_call_operand.vmem [shape: f32[2,4], index: 0, kind: input, shape index: {}]   ;;  %s40_s1 = inlined_call_operand.vmem [shape: f32[1,8], index: 1, kind: output, shape index: {}]  }
   0x1   :  { %v4_v0 = vld [vmem:[%s39_s0] sm:$0x3]  ;;  %s22_s0 = smov 4  }
   0x2   :  { %5 = vst [vmem:[#allocation1] sm:$0x3] %v4_v0 }
   0x9   :  { %v10_v1 = vld [vmem:[#allocation1 + $0x1] sm:$0x1]   ;;  %v6_v2 = vld [vmem:[#allocation1] sm:$0x1]  }
   0xa   :  { %11 = vrot.lane.b32.xlu0 %v10_v1, %s22_s0  ;;  %8 = vst.msk [vmem:[#allocation0] sm:$0x1] %vm7_vm0, %v6_v2  }
  0x7c   :  { %v12_v3 = vpop.permute.xlu0 %11  }
  0x7d   :  { %14 = vst.msk [vmem:[#allocation0] sm:$0x1] %vm13_vm1, %v12_v3  }
  0x84   :  { %v18_v4 = vld [vmem:[#allocation0] sm:$0x1] }
  0x85   :  { %20 = vst [vmem:[%s40_s1] sm:$0x1] %v18_v4 }

// kernel: convmixer_block.1
= control target key start
LH: loop header
LB: loop body
LE: loop exit
PB: predicated region body
PF: predicated region fallthrough
CT: control target
= control target key end

     0   :  { %v701_v0 = vmov 0   ;;  %s702_s30 = smov 17   ;;  %s703_s6 = smov 16   ;;  %v22_v19 = vlaneseq  ;;  %s1034_s1 = inlined_call_operand.vmem [shape: f32[9,8,1], index: 1, kind: input, shape index: {}]   ;;  %s1035_s0 = inlined_call_operand.vmem [shape: f32[8,256], index: 0, kind: input, shape index: {}]   ;;  %s1036_s2 = inlined_call_operand.vmem [shape: f32[2,8,1], index: 2, kind: input, shape index: {}]   ;;  %s1037_s3 = inlined_call_operand.vmem [shape: f32[4,8,256], index: 3, kind: input, shape index: {}]   ;;  %s1038_s4 = inlined_call_operand.vmem [shape: f32[8,8], index: 4, kind: input, shape index: {}]   ;;  %s1039_s5 = inlined_call_operand.vmem [shape: f32[8,256], index: 5, kind: output, shape index: {}]  }
   0x1   :  { %676 = vset.pattern.permute.xlu1 %v701_v0  ;;  %675 = vset.pattern.permute.xlu0 %v701_v0  ;;  %v626_v1 = vld [vmem:[%s1034_s1 + $0x10] sm:$0xff]  ;;  %v35_v2 = vld [vmem:[%s1034_s1] sm:$0xff]  ;;  %v627_v3 = vld [vmem:[%s1034_s1 + $0x18] sm:$0xff]  ;;  %s704_s9 = smov 15   ;;  %s705_s11 = smov 1  }
   0x2   :  { %91 = vperm.xlu1 %676, %v626_v1   ;;  %49 = vperm.xlu0 %675, %v35_v2   ;;  %v625_v4 = vld [vmem:[%s1034_s1 + $0x8] sm:$0xff]  ;;  %v761_v6 = vld [vmem:[%s1035_s0] sm:$0xff]  ;;  %v631_v9 = vld [vmem:[%s1034_s1 + $0x38] sm:$0xff]  ;;  %s706_s16 = smov 127   ;;  %s707_s19 = smov 113   ;;  %v798_v22 = vand.u32 127, %v22_v19 }
   0x3   :  { %v756_v5 = vld [vmem:[%s1035_s0 + $0x8] sm:$0xff]  ;;  %v628_v7 = vld [vmem:[%s1034_s1 + $0x20] sm:$0xff]  ;;  %v630_v10 = vld [vmem:[%s1034_s1 + $0x30] sm:$0xff]  ;;  %s708_s20 = smov 112   ;;  %s709_s23 = smov 111  }
   0x4   :  { %v629_v8 = vld [vmem:[%s1034_s1 + $0x28] sm:$0xff]  ;;  %v632_v11 = vld [vmem:[%s1034_s1 + $0x40] sm:$0xff]  ;;  %v803_v25 = vadd.s32 128, %v798_v22  ;;  %v25_v26 = vand.u32 15, %v798_v22  ;;  %vm62_vm0 = vcmp.lt.s32.totalorder %v798_v22, 16  ;;  %vm27_vm1 = vcmp.ge.s32.totalorder %v798_v22, 16 }
   0x5   :  { %v213_v12 = vld [vmem:[%s1036_s2] sm:$0xff]  ;;  %vm40_vm3 = vcmp.lt.s32.totalorder %v798_v22, 17  ;;  %vm82_vm5 = vcmp.lt.s32.totalorder %v798_v22, 15  ;;  %vm104_vm7 = vcmp.lt.s32.totalorder %v798_v22, 1  ;;  %vm135_vm11 = vcmp.lt.s32.totalorder %v798_v22, 127 }
   0x6   :  { %111 = vperm.xlu1 %676, %v627_v3   ;;  %69 = vperm.xlu0 %675, %v625_v4   ;;  %v26_v29 = vand.u32 15, %v803_v25  ;;  %vm811_vm2 = vcmp.ge.s32.totalorder %v25_v26, 1  ;;  %vm816_vm4 = vcmp.lt.s32.totalorder %v25_v26, 15  ;;  %vm30_vm12 = vcmp.lt.s32.totalorder %v803_v25, 240 }
   0x7   :  { %vm825_vm6 = vmand %vm27_vm1, %vm811_vm2  ;;  %vm155_vm13 = vcmp.lt.s32.totalorder %v798_v22, 113  ;;  %vm177_vm15 = vcmp.lt.s32.totalorder %v798_v22, 112 }
   0x8   :  { %vm830_vm8 = vcmp.ge.s32.totalorder %v26_v29, 1  ;;  %vm836_vm9 = vmand %vm27_vm1, %vm816_vm4  ;;  %vm840_vm10 = vcmp.lt.s32.totalorder %v26_v29, 15 }
   0x9   :  { %vm871_vm14 = vmand %vm30_vm12, %vm830_vm8 }
   0xa   :  { %38 = vrot.lane.b32.xlu1 %v756_v5, %s702_s30  ;;  %36 = vrot.lane.b32.xlu0 %v761_v6, %s702_s30 }
   0xe   :  { %60 = vrot.lane.b32.xlu1 %v756_v5, %s703_s6  ;;  %58 = vrot.lane.b32.xlu0 %v761_v6, %s703_s6 }
  0x12   :  { %78 = vrot.lane.b32.xlu1 %v761_v6, %s704_s9  ;;  %122 = vperm.xlu0 %675, %v628_v7  }
  0x16   :  { %142 = vperm.xlu1 %676, %v629_v8   ;;  %80 = vrot.lane.b32.xlu0 %v756_v5, %s704_s9 }
  0x1a   :  { %102 = vrot.lane.b32.xlu1 %v756_v5, %s705_s11  ;;  %100 = vrot.lane.b32.xlu0 %v761_v6, %s705_s11 }
  0x1e   :  { %184 = vperm.xlu1 %676, %v631_v9   ;;  %164 = vperm.xlu0 %675, %v630_v10  }
  0x22   :  { %133 = vrot.lane.b32.xlu1 %v756_v5, %s706_s16  ;;  %131 = vrot.lane.b32.xlu0 %v761_v6, %s706_s16 }
  0x26   :  { %151 = vrot.lane.b32.xlu1 %v761_v6, %s707_s19  ;;  %206 = vperm.xlu0 %675, %v632_v11  }
  0x2a   :  { %173 = vrot.lane.b32.xlu1 %v761_v6, %s708_s20  ;;  %153 = vrot.lane.b32.xlu0 %v756_v5, %s707_s19 }
  0x2e   :  { %216 = vperm.xlu1 %676, %v213_v12   ;;  %175 = vrot.lane.b32.xlu0 %v756_v5, %s708_s20 }
  0x32   :  { %195 = vrot.lane.b32.xlu1 %v756_v5, %s709_s23  ;;  %193 = vrot.lane.b32.xlu0 %v761_v6, %s709_s23 }
  0x81   :  { %v92_v13 = vpop.permute.xlu1 %91  ;;  %v50_v14 = vpop.permute.xlu0 %49 }
  0x85   :  { %v112_v15 = vpop.permute.xlu1 %111  ;;  %v70_v16 = vpop.permute.xlu0 %69 }
  0x89   :  { %v39_v17 = vpop.permute.xlu1 %38  ;;  %v37_v18 = vpop.permute.xlu0 %36 }
  0x8a   :  { %v42_v37 = vsel %vm40_vm3, %v39_v17, %v37_v18  ;;  %v41_v40 = vsel %vm40_vm3, %v37_v18, %v39_v17 }
  0x8b   :  { %v45_v48 = vsel %vm825_vm6, %v42_v37, 0.0  ;;  %v46_v51 = vsel %vm830_vm8, %v41_v40, 0.0  ;;  %vm390_vm6 = vcmask 64512  }
  0x8c   :  { %v52_v58 = vmul.f32 %v50_v14, %v45_v48  ;;  %v53_v61 = vmul.f32 %v50_v14, %v46_v51 }
  0x8d   :  { %v61_v20 = vpop.permute.xlu1 %60  ;;  %v59_v21 = vpop.permute.xlu0 %58 }
  0x8e   :  { %v64_v34 = vsel %vm62_vm0, %v61_v20, %v59_v21  ;;  %v63_v46 = vsel %vm62_vm0, %v59_v21, %v61_v20  ;;  %vm197_vm0 = vcmp.lt.s32.totalorder %v798_v22, 111 }
  0x8f   :  { %v65_v41 = vsel %vm27_vm1, %v64_v34, 0.0  ;;  %v73_v54 = vmul.f32 %v70_v16, %v63_v46  ;;  %vm201_vm1 = vmand %vm30_vm12, %vm840_vm10 }
  0x90   :  { %v72_v52 = vmul.f32 %v70_v16, %v65_v41 }
  0x91   :  { %v79_v23 = vpop.permute.xlu1 %78  ;;  %v800_v24 = vpop.permute.xlu0 %122  ;;  %v75_v2 = vadd.f32 %v73_v54, %v53_v61 }
  0x92   :  { %v74_v63 = vadd.f32 %v72_v52, %v52_v58  ;;  %v125_v18 = vmul.f32 %v800_v24, %v761_v6  ;;  %v126_v26 = vmul.f32 %v800_v24, %v756_v5 }
  0x95   :  { %v806_v27 = vpop.permute.xlu1 %142  ;;  %v81_v28 = vpop.permute.xlu0 %80 }
  0x96   :  { %v84_v39 = vsel %vm82_vm5, %v81_v28, %v79_v23  ;;  %v83_v43 = vsel %vm82_vm5, %v79_v23, %v81_v28 }
  0x97   :  { %v87_v49 = vsel %vm836_vm9, %v84_v39, 0.0  ;;  %v88_v53 = vsel %vm840_vm10, %v83_v43, 0.0 }
  0x98   :  { %v94_v59 = vmul.f32 %v92_v13, %v87_v49  ;;  %v95_v62 = vmul.f32 %v92_v13, %v88_v53 }
  0x99   :  { %v103_v32 = vpop.permute.xlu1 %102  ;;  %v101_v33 = vpop.permute.xlu0 %100 }
  0x9a   :  { %v106_v47 = vsel %vm104_vm7, %v103_v32, %v101_v33  ;;  %v105_v50 = vsel %vm104_vm7, %v101_v33, %v103_v32  ;;  %v96_v8 = vadd.f32 %v94_v59, %v74_v63  ;;  %v97_v10 = vadd.f32 %v95_v62, %v75_v2 }
  0x9b   :  { %v107_v55 = vsel %vm811_vm2, %v106_v47, 0.0  ;;  %v108_v60 = vsel %vm830_vm8, %v105_v50, 0.0 }
  0x9c   :  { %v114_v0 = vmul.f32 %v112_v15, %v107_v55  ;;  %v115_v3 = vmul.f32 %v112_v15, %v108_v60 }
  0x9d   :  { %v185_v44 = vpop.permute.xlu1 %184  ;;  %v165_v45 = vpop.permute.xlu0 %164 }
  0x9e   :  { %v116_v12 = vadd.f32 %v114_v0, %v96_v8  ;;  %v117_v14 = vadd.f32 %v115_v3, %v97_v10 }
  0xa0   :  { %v127_v32 = vadd.f32 %v125_v18, %v116_v12  ;;  %v128_v35 = vadd.f32 %v126_v26, %v117_v14 }
  0xa1   :  { %v134_v56 = vpop.permute.xlu1 %133  ;;  %v132_v57 = vpop.permute.xlu0 %131 }
  0xa2   :  { %v136_v1 = vsel %vm135_vm11, %v132_v57, %v134_v56  ;;  %v137_v9 = vsel %vm135_vm11, %v134_v56, %v132_v57 }
  0xa3   :  { %v138_v11 = vsel %vm816_vm4, %v136_v1, 0.0  ;;  %v139_v15 = vsel %vm840_vm10, %v137_v9, 0.0 }
  0xa4   :  { %v145_v20 = vmul.f32 %v806_v27, %v138_v11  ;;  %v146_v33 = vmul.f32 %v806_v27, %v139_v15 }
  0xa5   :  { %v152_v4 = vpop.permute.xlu1 %151  ;;  %v207_v7 = vpop.permute.xlu0 %206 }
  0xa6   :  { %v147_v38 = vadd.f32 %v145_v20, %v127_v32  ;;  %v148_v30 = vadd.f32 %v146_v33, %v128_v35 }
  0xa9   :  { %v174_v16 = vpop.permute.xlu1 %173  ;;  %v154_v17 = vpop.permute.xlu0 %153 }
  0xaa   :  { %v156_v21 = vsel %vm155_vm13, %v152_v4, %v154_v17  ;;  %v157_v23 = vsel %vm155_vm13, %v154_v17, %v152_v4 }
  0xab   :  { %v160_v28 = vsel %vm811_vm2, %v156_v21, 0.0  ;;  %v161_v29 = vsel %vm871_vm14, %v157_v23, 0.0 }
  0xac   :  { %v167_v34 = vmul.f32 %v165_v45, %v160_v28  ;;  %v168_v39 = vmul.f32 %v165_v45, %v161_v29 }
  0xad   :  { %v217_v36 = vpop.permute.xlu1 %216  ;;  %v176_v37 = vpop.permute.xlu0 %175 }
  0xae   :  { %v178_v40 = vsel %vm177_vm15, %v174_v16, %v176_v37  ;;  %v179_v41 = vsel %vm177_vm15, %v176_v37, %v174_v16  ;;  %v169_v43 = vadd.f32 %v167_v34, %v147_v38  ;;  %v170_v49 = vadd.f32 %v168_v39, %v148_v30 }
  0xaf   :  { %v181_v24 = vsel %vm30_vm12, %v179_v41, 0.0  ;;  %v187_v46 = vmul.f32 %v185_v44, %v178_v40 }
  0xb0   :  { %v188_v47 = vmul.f32 %v185_v44, %v181_v24  ;;  %v898_v24 = vshrl.u32 %v22_v19, 7 }
  0xb1   :  { %v196_v27 = vpop.permute.xlu1 %195  ;;  %v194_v48 = vpop.permute.xlu0 %193  ;;  %v189_v53 = vadd.f32 %v187_v46, %v169_v43 }
  0xb2   :  { %v198_v45 = vsel %vm197_vm0, %v194_v48, %v196_v27  ;;  %v199_v50 = vsel %vm197_vm0, %v196_v27, %v194_v48  ;;  %v190_v22 = vadd.f32 %v188_v47, %v170_v49  ;;  %vm280_vm5 = vcmp.ge.s32.totalorder %v898_v24, 4 }
  0xb3   :  { %v202_v51 = vsel %vm816_vm4, %v198_v45, 0.0  ;;  %v203_v52 = vsel %vm201_vm1, %v199_v50, 0.0  ;;  %vm278_vm4 = vcmp.lt.s32.totalorder %v898_v24, 4 }
  0xb4   :  { %v209_v54 = vmul.f32 %v207_v7, %v202_v51  ;;  %v210_v55 = vmul.f32 %v207_v7, %v203_v52 }
  0xb6   :  { %v211_v56 = vadd.f32 %v209_v54, %v189_v53  ;;  %v212_v44 = vadd.f32 %v210_v55, %v190_v22 }
  0xb8   :  { %v219_v57 = vadd.f32 %v217_v36, %v211_v56  ;;  %v220_v42 = vadd.f32 %v217_v36, %v212_v44 }
  0xba   :  { %v223_v58 = vmul.f32 0.70710677, %v219_v57  ;;  %v224_v25 = vmul.f32 0.70710677, %v220_v42  ;;  %v221_v46 = vmul.f32 0.5, %v219_v57  ;;  %v222_v48 = vmul.f32 0.5, %v220_v42 }
  0xbc   :  { %v225_v59 = vand.u32 2147483647, %v223_v58  ;;  %v226_v60 = vand.u32 2147483647, %v224_v25  ;;  %vm265_vm2 = vcmp.ge.f32.partialorder %v223_v58, 0.0  ;;  %vm266_vm3 = vcmp.ge.f32.partialorder %v224_v25, 0.0 }
  0xbe   :  { %v227_v61 = vmul.f32 0.3275911, %v225_v59  ;;  %v228_v62 = vmul.f32 0.3275911, %v226_v60  ;;  %v253_v31 = vsub.f32 0.0, %v225_v59  ;;  %v254_v1 = vsub.f32 0.0, %v226_v60 }
  0xc0   :  { %v229_v63 = vadd.f32 1.0, %v227_v61  ;;  %v230_v0 = vadd.f32 1.0, %v228_v62  ;;  %v255_v3 = vmul.f32 %v253_v31, %v225_v59  ;;  %v256_v7 = vmul.f32 %v254_v1, %v226_v60  ;;  %v635_v60 = vld [vmem:[%s1036_s2 + $0x8] sm:$0xff] }
  0xc2   :  { %677 = vrcp.f32 %v229_v63  ;;  %v257_v11 = vmul.f32 1.442695, %v255_v3  ;;  %v259_v13 = vmul.f32 1.442695, %v256_v7 }
  0xc3   :  { %679 = vrcp.f32 %v230_v0 }
  0xc4   :  { %681 = vpow2.f32 %v257_v11 }
  0xc5   :  { %683 = vpow2.f32 %v259_v13 }
  0xcc   :  { %v678_v2 = vpop.eup %677 }
  0xcd   :  { %v680_v4 = vpop.eup %679  ;;  %v235_v8 = vmul.f32 1.0614054, %v678_v2 }
  0xce   :  { %v236_v9 = vmul.f32 1.0614054, %v680_v4  ;;  %v682_v34 = vpop.eup %681 }
  0xcf   :  { %v237_v10 = vadd.f32 -1.4531521, %v235_v8  ;;  %v684_v36 = vpop.eup %683 }
  0xd0   :  { %v238_v12 = vadd.f32 -1.4531521, %v236_v9 }
  0xd1   :  { %v239_v14 = vmul.f32 %v678_v2, %v237_v10 }
  0xd2   :  { %v240_v15 = vmul.f32 %v680_v4, %v238_v12 }
  0xd3   :  { %v241_v16 = vadd.f32 1.4214138, %v239_v14 }
  0xd4   :  { %v242_v17 = vadd.f32 1.4214138, %v240_v15 }
  0xd5   :  { %v243_v18 = vmul.f32 %v678_v2, %v241_v16 }
  0xd6   :  { %v244_v20 = vmul.f32 %v680_v4, %v242_v17 }
  0xd7   :  { %v245_v21 = vadd.f32 -0.28449672, %v243_v18 }
  0xd8   :  { %v246_v23 = vadd.f32 -0.28449672, %v244_v20 }
  0xd9   :  { %v247_v26 = vmul.f32 %v678_v2, %v245_v21 }
  0xda   :  { %v248_v28 = vmul.f32 %v680_v4, %v246_v23 }
  0xdb   :  { %v249_v29 = vadd.f32 0.2548296, %v247_v26 }
  0xdc   :  { %v250_v32 = vadd.f32 0.2548296, %v248_v28 }
  0xdd   :  { %v251_v33 = vmul.f32 %v678_v2, %v249_v29 }
  0xde   :  { %v252_v35 = vmul.f32 %v680_v4, %v250_v32 }
  0xdf   :  { %v261_v37 = vmul.f32 %v682_v34, %v251_v33 }
  0xe0   :  { %v262_v38 = vmul.f32 %v684_v36, %v252_v35  ;;  %v710_v35 = vmov 0.0  }
  0xe1   :  { %v263_v39 = vsub.f32 1.0, %v261_v37  ;;  %458 = vmatprep.mubr.f32.mxu0 %v710_v35 }
  0xe2   :  { %v264_v40 = vsub.f32 1.0, %v262_v38 }
  0xe3   :  { %v267_v41 = vsub.f32 0.0, %v263_v39 }
  0xe4   :  { %v268_v30 = vsub.f32 0.0, %v264_v40 }
  0xe5   :  { %v269_v43 = vsel %vm265_vm2, %v263_v39, %v267_v41 }
  0xe6   :  { %v270_v47 = vsel %vm266_vm3, %v264_v40, %v268_v30  ;;  %v271_v27 = vadd.f32 1.0, %v269_v43 }
  0xe7   :  { %v272_v49 = vadd.f32 1.0, %v270_v47 }
  0xe8   :  { %v901_v45 = vmul.f32 %v271_v27, %v221_v46 }
  0xe9   :  { %v903_v50 = vmul.f32 %v272_v49, %v222_v48  ;;  %v284_v49 = vld [vmem:[%s1037_s3 + $0x8] sm:$0xff] }
  0xea   :  { %v290_v19 = vsel %vm278_vm4, %v901_v45, 0.0  ;;  %v288_v51 = vmul.f32 %v901_v45, %v901_v45  ;;  %v331_v56 = vsel %vm280_vm5, %v901_v45, 0.0 }
  0xeb   :  { %v291_v52 = vsel %vm278_vm4, %v903_v50, 0.0  ;;  %v289_v53 = vmul.f32 %v903_v50, %v903_v50  ;;  %v332_v44 = vsel %vm280_vm5, %v903_v50, 0.0 }
  0xec   :  { %v292_v22 = vadd.f32 %v291_v52, %v290_v19  ;;  %v303_v54 = vsel %vm278_vm4, %v288_v51, 0.0  ;;  %v333_v42 = vadd.f32 %v332_v44, %v331_v56  ;;  %v344_v58 = vsel %vm280_vm5, %v288_v51, 0.0  ;;  %v283_v19 = vld [vmem:[%s1037_s3] sm:$0xff] }
  0xed   :  { %v304_v55 = vsel %vm278_vm4, %v289_v53, 0.0  ;;  %v345_v25 = vsel %vm280_vm5, %v289_v53, 0.0 }
  0xee   :  { %293 = vadd.xlane.f32.xlu0 %v292_v22  ;;  %v305_v57 = vadd.f32 %v304_v55, %v303_v54  ;;  %v346_v59 = vadd.f32 %v345_v25, %v344_v58 }
  0xf0   :  { %306 = vadd.xlane.f32.xlu1 %v305_v57  ;;  %v382_v57 = vld [vmem:[%s1038_s4] sm:$0xff] }
  0xf2   :  { %334 = vadd.xlane.f32.xlu0 %v333_v42 }
  0xf6   :  { %347 = vadd.xlane.f32.xlu0 %v346_v59 }
 0x101   :  { %387 = vperm.xlu1 %676, %v635_v60  }
 0x17b   :  { %v294_v61 = vpop.xlane.xlu0 %293 }
 0x17c   :  { %v295_v62 = vrot.slane %v294_v61, 4 }
 0x17d   :  { %v307_v63 = vpop.xlane.xlu1 %306 }
 0x17e   :  { %v296_v0 = vadd.f32 %v295_v62, %v294_v61  ;;  %v308_v31 = vrot.slane %v307_v63, 4 }
 0x17f   :  { %v335_v12 = vpop.xlane.xlu0 %334 }
 0x180   :  { %v297_v1 = vrot.slane %v296_v0, 2  ;;  %v309_v2 = vadd.f32 %v308_v31, %v307_v63  ;;  %v336_v14 = vrot.slane %v335_v12, 4 }
 0x181   :  { %v388_v42 = vpop.permute.xlu1 %387 }
 0x182   :  { %v310_v3 = vrot.slane %v309_v2, 2  ;;  %v298_v4 = vadd.f32 %v297_v1, %v296_v0  ;;  %v337_v16 = vadd.f32 %v336_v14, %v335_v12 }
 0x183   :  { %v348_v13 = vpop.xlane.xlu0 %347 }
 0x184   :  { %v299_v7 = vrot.slane %v298_v4, 1  ;;  %v311_v8 = vadd.f32 %v310_v3, %v309_v2  ;;  %v349_v15 = vrot.slane %v348_v13, 4  ;;  %v338_v18 = vrot.slane %v337_v16, 2 }
 0x186   :  { %v300_v9 = vadd.f32 %v299_v7, %v298_v4  ;;  %v312_v10 = vrot.slane %v311_v8, 1  ;;  %v350_v17 = vadd.f32 %v349_v15, %v348_v13  ;;  %v339_v23 = vadd.f32 %v338_v18, %v337_v16 }
 0x188   :  { %641 = vpush %v300_v9  ;;  %v313_v11 = vadd.f32 %v312_v10, %v311_v8  ;;  %v351_v20 = vrot.slane %v350_v17, 2  ;;  %v340_v28 = vrot.slane %v339_v23, 1 }
 0x18a   :  { %643 = vpush %v313_v11  ;;  %v352_v26 = vadd.f32 %v351_v20, %v350_v17  ;;  %v341_v33 = vadd.f32 %v340_v28, %v339_v23 }
 0x18c   :  { %v353_v29 = vrot.slane %v352_v26, 1 }
 0x18e   :  { %v354_v34 = vadd.f32 %v353_v29, %v352_v26 }
 0x1b9   :  { %s642_s2 = spop %641 }
 0x1ba   :  { %s933_s25 = smul.f32 0.0009765625, %s642_s2 }
 0x1bb   :  { %s644_s26 = spop %643 }
 0x1bc   :  { %s316_s27 = smul.f32 %s933_s25, %s933_s25  ;;  %v327_v36 = vstv %s933_s25 }
 0x1bd   :  { %s315_s28 = smul.f32 0.0009765625, %s644_s26  ;;  %v328_v37 = vsel %vm278_vm4, %v327_v36, 0.0 }
 0x1bf   :  { %s317_s29 = ssub.f32 %s315_s28, %s316_s27 }
 0x1c1   :  { %s318_s30 = sadd.f32 1e-05, %s317_s29 }
 0x1c3   :  { %v319_v21 = vstv %s318_s30  ;;  %s322_s6 = smul.f32 0.5, %s318_s30 }
 0x1c4   :  { %685 = vrsqrt.f32 %v319_v21 }
 0x1ce   :  { %v686_v32 = vpop.eup %685 }
 0x1cf   :  { %645 = vpush %v686_v32 }
 0x1d0   :  { %647 = vpush %v341_v33 }
 0x1d1   :  { %649 = vpush %v354_v34 }
 0x200   :  { %s646_s7 = spop %645 }
 0x201   :  { %s323_s8 = smul.f32 %s646_s7, %s322_s6  ;;  %s648_s9 = spop %647 }
 0x202   :  { %s343_s0 = smul.f32 0.0009765625, %s648_s9  ;;  %s650_s10 = spop %649 }
 0x203   :  { %s324_s11 = smul.f32 %s646_s7, %s323_s8 }
 0x204   :  { %s357_s12 = smul.f32 %s343_s0, %s343_s0  ;;  %v368_v38 = vstv %s343_s0 }
 0x205   :  { %s325_s13 = ssub.f32 1.5, %s324_s11  ;;  %v369_v39 = vsel %vm280_vm5, %v368_v38, %v328_v37  ;;  %s356_s14 = smul.f32 0.0009765625, %s650_s10 }
 0x206   :  { %v372_v46 = vsub.f32 %v901_v45, %v369_v39  ;;  %v373_v47 = vsub.f32 %v903_v50, %v369_v39  ;;  %v634_v45 = vld [vmem:[%s1037_s3 + $0x18] sm:$0xff]  ;;  %v633_v50 = vld [vmem:[%s1037_s3 + $0x10] sm:$0xff] }
 0x207   :  { %s326_s15 = smul.f32 %s646_s7, %s325_s13  ;;  %s358_s16 = ssub.f32 %s356_s14, %s357_s12 }
 0x209   :  { %s359_s17 = sadd.f32 1e-05, %s358_s16  ;;  %v329_v30 = vstv %s326_s15 }
 0x20a   :  { %v330_v43 = vsel %vm278_vm4, %v329_v30, 0.0 }
 0x20b   :  { %v360_v40 = vstv %s359_s17  ;;  %s363_s18 = smul.f32 0.5, %s359_s17 }
 0x20c   :  { %687 = vrsqrt.f32 %v360_v40 }
 0x216   :  { %v688_v41 = vpop.eup %687 }
 0x217   :  { %651 = vpush %v688_v41 }
 0x248   :  { %s652_s19 = spop %651 }
 0x249   :  { %s364_s20 = smul.f32 %s652_s19, %s363_s18 }
 0x24b   :  { %s365_s21 = smul.f32 %s652_s19, %s364_s20 }
 0x24d   :  { %s366_s22 = ssub.f32 1.5, %s365_s21 }
 0x24f   :  { %s367_s23 = smul.f32 %s652_s19, %s366_s22 }
 0x251   :  { %v370_v27 = vstv %s367_s23 }
 0x252   :  { %v371_v48 = vsel %vm280_vm5, %v370_v27, %v330_v43 }
 0x253   :  { %v374_v51 = vmul.f32 %v372_v46, %v371_v48  ;;  %v375_v52 = vmul.f32 %v373_v47, %v371_v48 }
 0x255   :  { %v377_v53 = vmul.f32 %v375_v52, %v284_v49  ;;  %v376_v22 = vmul.f32 %v374_v51, %v283_v19 }
 0x257   :  { %v379_v54 = vadd.f32 %v634_v45, %v377_v53  ;;  %v378_v55 = vadd.f32 %v633_v50, %v376_v22 }
 0x259   :  { %v961_v56 = vadd.f32 %v379_v54, %v756_v5  ;;  %v964_v44 = vadd.f32 %v378_v55, %v761_v6 }
 0x25b   :  { %394 = vmatprep.subr.mxu0 %v961_v56 }
 0x25c   :  { %395 = vmatpush1.msra.mxu0 %v964_v44 }
 0x25d   :  { %636 = vmatmul.mubr.msk.f32.vlgmr.msra.gmra.mrb[0].mxu0 %vm390_vm6, %v382_v57 }
 0x330   :  { %v460_v58 = vpop.f32.mrb[0].mxu0 }
 0x331   :  { %v461_v25 = vadd.f32 %v460_v58, %v388_v42  ;;  %v462_v59 = vpop.f32.mrb[1].mxu0 }
 0x332   :  { %v463_v60 = vadd.f32 %v462_v59, %v388_v42 }
 0x333   :  { %v467_v5 = vmul.f32 0.70710677, %v461_v25  ;;  %v465_v27 = vmul.f32 0.5, %v461_v25 }
 0x334   :  { %v468_v61 = vmul.f32 0.70710677, %v463_v60  ;;  %v466_v19 = vmul.f32 0.5, %v463_v60 }
 0x335   :  { %v469_v62 = vand.u32 2147483647, %v467_v5  ;;  %vm509_vm7 = vcmp.ge.f32.partialorder %v467_v5, 0.0 }
 0x336   :  { %v470_v6 = vand.u32 2147483647, %v468_v61  ;;  %vm510_vm8 = vcmp.ge.f32.partialorder %v468_v61, 0.0 }
 0x337   :  { %v471_v63 = vmul.f32 0.3275911, %v469_v62  ;;  %v497_v2 = vsub.f32 0.0, %v469_v62 }
 0x338   :  { %v472_v0 = vmul.f32 0.3275911, %v470_v6  ;;  %v498_v3 = vsub.f32 0.0, %v470_v6 }
 0x339   :  { %v473_v31 = vadd.f32 1.0, %v471_v63  ;;  %v499_v7 = vmul.f32 %v497_v2, %v469_v62 }
 0x33a   :  { %v474_v1 = vadd.f32 1.0, %v472_v0  ;;  %v500_v10 = vmul.f32 %v498_v3, %v470_v6 }
 0x33b   :  { %689 = vrcp.f32 %v473_v31  ;;  %v501_v13 = vmul.f32 1.442695, %v499_v7 }
 0x33c   :  { %691 = vrcp.f32 %v474_v1  ;;  %v503_v16 = vmul.f32 1.442695, %v500_v10 }
 0x33d   :  { %693 = vpow2.f32 %v501_v13 }
 0x33e   :  { %695 = vpow2.f32 %v503_v16 }
 0x345   :  { %v690_v4 = vpop.eup %689 }
 0x346   :  { %v692_v8 = vpop.eup %691  ;;  %v479_v9 = vmul.f32 1.0614054, %v690_v4 }
 0x347   :  { %v480_v11 = vmul.f32 1.0614054, %v692_v8  ;;  %v694_v36 = vpop.eup %693 }
 0x348   :  { %v481_v12 = vadd.f32 -1.4531521, %v479_v9  ;;  %v696_v38 = vpop.eup %695 }
 0x349   :  { %v482_v14 = vadd.f32 -1.4531521, %v480_v11 }
 0x34a   :  { %v483_v15 = vmul.f32 %v690_v4, %v481_v12 }
 0x34b   :  { %v484_v17 = vmul.f32 %v692_v8, %v482_v14 }
 0x34c   :  { %v485_v18 = vadd.f32 1.4214138, %v483_v15 }
 0x34d   :  { %v486_v20 = vadd.f32 1.4214138, %v484_v17 }
 0x34e   :  { %v487_v21 = vmul.f32 %v690_v4, %v485_v18 }
 0x34f   :  { %v488_v23 = vmul.f32 %v692_v8, %v486_v20 }
 0x350   :  { %v489_v26 = vadd.f32 -0.28449672, %v487_v21 }
 0x351   :  { %v490_v28 = vadd.f32 -0.28449672, %v488_v23 }
 0x352   :  { %v491_v29 = vmul.f32 %v690_v4, %v489_v26 }
 0x353   :  { %v492_v32 = vmul.f32 %v692_v8, %v490_v28 }
 0x354   :  { %v493_v33 = vadd.f32 0.2548296, %v491_v29 }
 0x355   :  { %v494_v34 = vadd.f32 0.2548296, %v492_v32 }
 0x356   :  { %v495_v35 = vmul.f32 %v690_v4, %v493_v33 }
 0x357   :  { %v496_v37 = vmul.f32 %v692_v8, %v494_v34 }
 0x358   :  { %v505_v39 = vmul.f32 %v694_v36, %v495_v35 }
 0x359   :  { %v506_v40 = vmul.f32 %v696_v38, %v496_v37 }
 0x35a   :  { %v507_v41 = vsub.f32 1.0, %v505_v39 }
 0x35b   :  { %v508_v30 = vsub.f32 1.0, %v506_v40 }
 0x35c   :  { %v511_v43 = vsub.f32 0.0, %v507_v41 }
 0x35d   :  { %v512_v46 = vsub.f32 0.0, %v508_v30 }
 0x35e   :  { %v513_v47 = vsel %vm509_vm7, %v507_v41, %v511_v43 }
 0x35f   :  { %v515_v48 = vadd.f32 1.0, %v513_v47  ;;  %v514_v49 = vsel %vm510_vm8, %v508_v30, %v512_v46 }
 0x360   :  { %v516_v51 = vadd.f32 1.0, %v514_v49  ;;  %v638_v49 = vld [vmem:[%s1037_s3 + $0x28] sm:$0xff] }
 0x361   :  { %v971_v52 = vmul.f32 %v515_v48, %v465_v27  ;;  %v637_v48 = vld [vmem:[%s1037_s3 + $0x20] sm:$0xff] }
 0x362   :  { %v973_v45 = vmul.f32 %v516_v51, %v466_v19 }
 0x363   :  { %v527_v50 = vsel %vm278_vm4, %v971_v52, 0.0  ;;  %v525_v53 = vmul.f32 %v971_v52, %v971_v52  ;;  %v568_v25 = vsel %vm280_vm5, %v971_v52, 0.0 }
 0x364   :  { %v528_v22 = vsel %vm278_vm4, %v973_v45, 0.0  ;;  %v526_v54 = vmul.f32 %v973_v45, %v973_v45  ;;  %v569_v59 = vsel %vm280_vm5, %v973_v45, 0.0 }
 0x365   :  { %v529_v55 = vadd.f32 %v528_v22, %v527_v50  ;;  %v540_v57 = vsel %vm278_vm4, %v525_v53, 0.0  ;;  %v570_v60 = vadd.f32 %v569_v59, %v568_v25  ;;  %v581_v5 = vsel %vm280_vm5, %v525_v53, 0.0 }
 0x366   :  { %v541_v42 = vsel %vm278_vm4, %v526_v54, 0.0  ;;  %v582_v61 = vsel %vm280_vm5, %v526_v54, 0.0 }
 0x367   :  { %530 = vadd.xlane.f32.xlu0 %v529_v55  ;;  %v542_v58 = vadd.f32 %v541_v42, %v540_v57  ;;  %v583_v62 = vadd.f32 %v582_v61, %v581_v5 }
 0x36b   :  { %543 = vadd.xlane.f32.xlu0 %v542_v58 }
 0x36f   :  { %571 = vadd.xlane.f32.xlu0 %v570_v60 }
 0x373   :  { %584 = vadd.xlane.f32.xlu0 %v583_v62 }
 0x3f4   :  { %v531_v6 = vpop.xlane.xlu0 %530 }
 0x3f5   :  { %v532_v63 = vrot.slane %v531_v6, 4 }
 0x3f7   :  { %v533_v0 = vadd.f32 %v532_v63, %v531_v6 }
 0x3f8   :  { %v544_v31 = vpop.xlane.xlu0 %543 }
 0x3f9   :  { %v534_v1 = vrot.slane %v533_v0, 2  ;;  %v545_v2 = vrot.slane %v544_v31, 4 }
 0x3fb   :  { %v546_v3 = vadd.f32 %v545_v2, %v544_v31  ;;  %v535_v4 = vadd.f32 %v534_v1, %v533_v0 }
 0x3fc   :  { %v572_v13 = vpop.xlane.xlu0 %571 }
 0x3fd   :  { %v547_v7 = vrot.slane %v546_v3, 2  ;;  %v536_v8 = vrot.slane %v535_v4, 1  ;;  %v573_v15 = vrot.slane %v572_v13, 4 }
 0x3ff   :  { %v537_v9 = vadd.f32 %v536_v8, %v535_v4  ;;  %v548_v10 = vadd.f32 %v547_v7, %v546_v3  ;;  %v574_v17 = vadd.f32 %v573_v15, %v572_v13 }
 0x400   :  { %v585_v14 = vpop.xlane.xlu0 %584 }
 0x401   :  { %653 = vpush %v537_v9  ;;  %v549_v11 = vrot.slane %v548_v10, 1  ;;  %v586_v16 = vrot.slane %v585_v14, 4  ;;  %v575_v20 = vrot.slane %v574_v17, 2 }
 0x403   :  { %v550_v12 = vadd.f32 %v549_v11, %v548_v10  ;;  %v587_v18 = vadd.f32 %v586_v16, %v585_v14  ;;  %v576_v26 = vadd.f32 %v575_v20, %v574_v17 }
 0x405   :  { %655 = vpush %v550_v12  ;;  %v588_v21 = vrot.slane %v587_v18, 2  ;;  %v577_v29 = vrot.slane %v576_v26, 1 }
 0x407   :  { %v589_v28 = vadd.f32 %v588_v21, %v587_v18  ;;  %v578_v34 = vadd.f32 %v577_v29, %v576_v26 }
 0x409   :  { %v590_v32 = vrot.slane %v589_v28, 1 }
 0x40b   :  { %v591_v35 = vadd.f32 %v590_v32, %v589_v28 }
 0x432   :  { %s654_s4 = spop %653 }
 0x433   :  { %s999_s7 = smul.f32 0.0009765625, %s654_s4 }
 0x435   :  { %s553_s8 = smul.f32 %s999_s7, %s999_s7  ;;  %v564_v36 = vstv %s999_s7 }
 0x436   :  { %s656_s9 = spop %655  ;;  %v565_v37 = vsel %vm278_vm4, %v564_v36, 0.0 }
 0x437   :  { %s552_s0 = smul.f32 0.0009765625, %s656_s9 }
 0x439   :  { %s554_s10 = ssub.f32 %s552_s0, %s553_s8 }
 0x43b   :  { %s555_s11 = sadd.f32 1e-05, %s554_s10 }
 0x43d   :  { %v556_v23 = vstv %s555_s11  ;;  %s559_s12 = smul.f32 0.5, %s555_s11 }
 0x43e   :  { %697 = vrsqrt.f32 %v556_v23 }
 0x448   :  { %v698_v33 = vpop.eup %697 }
 0x449   :  { %657 = vpush %v698_v33 }
 0x44a   :  { %659 = vpush %v578_v34 }
 0x44b   :  { %661 = vpush %v591_v35 }
 0x47a   :  { %s658_s13 = spop %657 }
 0x47b   :  { %s560_s14 = smul.f32 %s658_s13, %s559_s12  ;;  %s660_s15 = spop %659 }
 0x47c   :  { %s580_s16 = smul.f32 0.0009765625, %s660_s15  ;;  %s662_s17 = spop %661 }
 0x47d   :  { %s561_s18 = smul.f32 %s658_s13, %s560_s14 }
 0x47e   :  { %s594_s19 = smul.f32 %s580_s16, %s580_s16  ;;  %v605_v38 = vstv %s580_s16 }
 0x47f   :  { %s562_s20 = ssub.f32 1.5, %s561_s18  ;;  %v606_v39 = vsel %vm280_vm5, %v605_v38, %v565_v37  ;;  %s593_s21 = smul.f32 0.0009765625, %s662_s17 }
 0x480   :  { %v609_v46 = vsub.f32 %v971_v52, %v606_v39  ;;  %v610_v47 = vsub.f32 %v973_v45, %v606_v39  ;;  %v639_v52 = vld [vmem:[%s1037_s3 + $0x30] sm:$0xff]  ;;  %v640_v45 = vld [vmem:[%s1037_s3 + $0x38] sm:$0xff] }
 0x481   :  { %s563_s22 = smul.f32 %s658_s13, %s562_s20  ;;  %s595_s23 = ssub.f32 %s593_s21, %s594_s19 }
 0x483   :  { %s596_s1 = sadd.f32 1e-05, %s595_s23  ;;  %v566_v30 = vstv %s563_s22 }
 0x484   :  { %v567_v43 = vsel %vm278_vm4, %v566_v30, 0.0 }
 0x485   :  { %v597_v40 = vstv %s596_s1  ;;  %s600_s24 = smul.f32 0.5, %s596_s1 }
 0x486   :  { %699 = vrsqrt.f32 %v597_v40 }
 0x490   :  { %v700_v41 = vpop.eup %699 }
 0x491   :  { %663 = vpush %v700_v41 }
 0x4c2   :  { %s664_s2 = spop %663 }
 0x4c3   :  { %s601_s25 = smul.f32 %s664_s2, %s600_s24 }
 0x4c5   :  { %s602_s26 = smul.f32 %s664_s2, %s601_s25 }
 0x4c7   :  { %s603_s27 = ssub.f32 1.5, %s602_s26 }
 0x4c9   :  { %s604_s28 = smul.f32 %s664_s2, %s603_s27 }
 0x4cb   :  { %v607_v27 = vstv %s604_s28 }
 0x4cc   :  { %v608_v19 = vsel %vm280_vm5, %v607_v27, %v567_v43 }
 0x4cd   :  { %v611_v51 = vmul.f32 %v609_v46, %v608_v19  ;;  %v612_v50 = vmul.f32 %v610_v47, %v608_v19 }
 0x4cf   :  { %v613_v53 = vmul.f32 %v637_v48, %v611_v51  ;;  %v614_v22 = vmul.f32 %v638_v49, %v612_v50 }
 0x4d1   :  { %v615_v54 = vadd.f32 %v639_v52, %v613_v53  ;;  %v616_v55 = vadd.f32 %v640_v45, %v614_v22 }
 0x4d3   :  { %v617_v57 = vadd.f32 %v615_v54, %v964_v44  ;;  %v618_v42 = vadd.f32 %v616_v55, %v961_v56 }
 0x4d5   :  { %619 = vst [vmem:[%s1039_s5] sm:$0xff] %v617_v57  ;;  %620 = vst [vmem:[%s1039_s5 + $0x8] sm:$0xff] %v618_v42 }

</bundles_post_ra>
